<compile_context>
chip_gen: v6e
topology: v6e:2x2x1
jax: 0.10.0
libtpu: 0.0.40
codegen_flags: <defaults>
</compile_context>

<pallas_src>
import jax
import jax.numpy as jnp
from jax.experimental import pallas as pl
from jax.experimental.pallas import tpu as pltpu


def _to_homogeneous_kernel(x_ref, o_ref):
    """Copy the D input columns and write a constant 1.0 into column D."""
    d = x_ref.shape[-1]
    rows = x_ref.shape[0]
    # Two static-slice stores cover the full output tile.
    o_ref[:, :d] = x_ref[...].astype(o_ref.dtype)
    o_ref[:, d:] = jnp.ones((rows, 1), dtype=o_ref.dtype)


def _pick_row_tile(m, d, itemsize, vmem_budget_bytes=8 * 1024 * 1024):
    """Largest 8-aligned row tile whose (double-buffered in+out) fits the budget."""
    if m % 8 != 0:
        return m  # single full-array block (exempt from (8,128) divisibility)
    # bytes per row for input tile + output tile, x2 for double buffering.
    bytes_per_row = (d + (d + 1)) * itemsize * 2
    tm = max(8, (vmem_budget_bytes // max(bytes_per_row, 1)) // 8 * 8)
    return min(m, tm)


def convert_points_to_homogeneous(points):
    """JAX/Pallas equivalent of tgm.convert_points_to_homogeneous."""
    if points.ndim < 2:
        raise ValueError(
            "Input must be at least a 2D tensor. Got {}".format(points.shape))

    *lead, d = points.shape
    m = 1
    for s in lead:
        m *= s
    x2 = points.reshape(m, d)

    tm = _pick_row_tile(m, d, points.dtype.itemsize)
    grid_m = pl.cdiv(m, tm)

    out2 = pl.pallas_call(
        _to_homogeneous_kernel,
        out_shape=jax.ShapeDtypeStruct((m, d + 1), points.dtype),
        grid=(grid_m,),
        in_specs=[pl.BlockSpec((tm, d), lambda i: (i, 0))],
        out_specs=pl.BlockSpec((tm, d + 1), lambda i: (i, 0)),
        compiler_params=pltpu.CompilerParams(
            dimension_semantics=("parallel",)),
    )(x2)

    return out2.reshape(*lead, d + 1)


class ConvertPointsToHomogeneous:
    """JAX/Pallas port of torchgeometry's ConvertPointsToHomogeneous module."""

    def __call__(self, points):
        return convert_points_to_homogeneous(points)


def _reference(points):
    """Pure-JAX reference: constant-pad the last dim with 1.0."""
    pad_widths = [(0, 0)] * (points.ndim - 1) + [(0, 1)]
    return jnp.pad(points, pad_widths, mode="constant", constant_values=1.0)


if __name__ == "__main__":
    key = jax.random.PRNGKey(0)
    module = ConvertPointsToHomogeneous()

    # 3-D case, matching the docstring example: (B, N, 3) -> (B, N, 4)
    k1, k2, k3 = jax.random.split(key, 3)
    x3 = jax.random.uniform(k1, (2, 4, 3), jnp.float32)
    out3 = jax.block_until_ready(module(x3))
    ref3 = _reference(x3)
    assert out3.shape == (2, 4, 4)
    assert jnp.allclose(out3, ref3, atol=0.0, rtol=0.0), "3D mismatch vs reference"

    # 2-D case: (D, N) -> (D, N + 1), exercises the rank-2 / non-8-aligned path.
    x2 = jax.random.uniform(k2, (5, 3), jnp.float32)
    out2 = jax.block_until_ready(module(x2))
    ref2 = _reference(x2)
    assert out2.shape == (5, 4)
    assert jnp.allclose(out2, ref2, atol=0.0, rtol=0.0), "2D mismatch vs reference"

    # Larger 8-aligned case: exercises the tiled / pipelined grid path.
    xl = jax.random.uniform(k3, (16, 256, 3), jnp.float32)
    outl = jax.block_until_ready(module(xl))
    refl = _reference(xl)
    assert outl.shape == (16, 256, 4)
    assert jnp.allclose(outl, refl, atol=0.0, rtol=0.0), "tiled mismatch vs reference"

    print("KERNEL_OK")
</pallas_src>

<mosaic_0001>
module attributes {stable_mosaic.version = 11 : i64} {
  func.func @_to_homogeneous_kernel(%arg0: i32, %arg1: memref<8x3xf32, #tpu.memory_space<vmem>>, %arg2: memref<8x4xf32, #tpu.memory_space<vmem>>) attributes {dimension_semantics = [#tpu.dimension_semantics<parallel>], iteration_bounds = array<i64: 1>, scalar_prefetch = 0 : i64, scratch_operands = 0 : i64, tpu.core_type = #tpu.core_type<tc>, window_params = [{transform_indices = @transform_0, window_bounds = array<i64: 8, 3>}, {transform_indices = @transform_1, window_bounds = array<i64: 8, 4>}]} {
    %c0 = arith.constant 0 : index
    %c0_0 = arith.constant 0 : index
    %0 = vector.load %arg1[%c0, %c0_0] : memref<8x3xf32, #tpu.memory_space<vmem>>, vector<8x3xf32>
    %c0_1 = arith.constant 0 : index
    %c0_2 = arith.constant 0 : index
    %1 = vector.load %arg2[%c0_1, %c0_2] : memref<8x4xf32, #tpu.memory_space<vmem>>, vector<8x3xf32>
    tpu.vector_store %arg2[%c0_1, %c0_2], %0 {strides = array<i32>} : memref<8x4xf32, #tpu.memory_space<vmem>>, vector<8x3xf32>,
    %cst = arith.constant 1.000000e+00 : f32
    %2 = vector.broadcast %cst : f32 to vector<8x1xf32>
    %c0_3 = arith.constant 0 : index
    %c3 = arith.constant 3 : index
    %3 = vector.load %arg2[%c0_3, %c3] : memref<8x4xf32, #tpu.memory_space<vmem>>, vector<8x1xf32>
    tpu.vector_store %arg2[%c0_3, %c3], %2 {strides = array<i32>} : memref<8x4xf32, #tpu.memory_space<vmem>>, vector<8x1xf32>,
    return
  }
  func.func @transform_0(%arg0: i32) -> (i32, i32) {
    %c0_i32 = arith.constant 0 : i32
    %c0_i32_0 = arith.constant 0 : i32
    return %arg0, %c0_i32 : i32, i32
  }
  func.func @transform_1(%arg0: i32) -> (i32, i32) {
    %c0_i32 = arith.constant 0 : i32
    %c0_i32_0 = arith.constant 0 : i32
    return %arg0, %c0_i32 : i32, i32
  }
}

</mosaic_0001>

<bundles_post_ra>
// kernel: tpu_custom_call.1
= control target key start
LH: loop header
LB: loop body
LE: loop exit
PB: predicated region body
PF: predicated region fallthrough
CT: control target
= control target key end

     0   :  { %vm9_vm0 = vcmask 23552   ;;  %vm11_vm1 = vcmask 31768   ;;  %v18_v1 = vmov 1.0   ;;  %s38_s0 = inlined_call_operand.vmem [shape: f32[8,3], index: 0, kind: input, shape index: {}]   ;;  %s39_s1 = inlined_call_operand.vmem [shape: f32[8,4], index: 1, kind: output, shape index: {}]  }
   0x1   :  { %v8_v0 = vld [vmem:[%s38_s0] sm:$0xff] }
   0x2   :  { %10 = vst.msk [vmem:[%s39_s1] sm:$0xff] %vm9_vm0, %v8_v0 }
   0x3   :  { %12 = vst.msk [vmem:[%s39_s1] sm:$0xff] %vm11_vm1, %v18_v1 }

</bundles_post_ra>
